<compile_context>
chip_gen: v7x
topology: tpu7x:2x2x1
jax: 0.10.0
libtpu: 0.0.40
codegen_flags: <defaults>
</compile_context>

<pallas_src>
import functools

import jax
import jax.numpy as jnp
from jax.experimental import pallas as pl
from jax.experimental.pallas import tpu as pltpu


def _pick_tile(dim, target):
    """Largest divisor of `dim` that is a multiple of 8 and <= target (else `dim` itself)."""
    if dim <= target:
        return dim
    for t in range(target, 0, -1):
        if dim % t == 0 and t % 8 == 0:
            return t
    return dim


def _fused_memory_kernel(x_ref, f_ref, lab_ref, mask_ref, loss_ref,
                         acc_ref, cnt_ref, *, inv_temp, num_clusters):
    """One (b, n) grid step: accumulate per-cluster similarity; finalize loss at last n."""
    n = pl.program_id(1)
    nt = (((1,), (1,)), ((), ()))  # contract last dims ("NT" form, no in-kernel .T)

    @pl.when(n == 0)
    def _init():
        acc_ref[...] = jnp.zeros_like(acc_ref)
        cnt_ref[...] = jnp.zeros_like(cnt_ref)

    # logits tile: (tb, tn) = inputs (tb,F) . features_tile (tn,F)^T, fused 1/temp scale.
    logits = jax.lax.dot_general(
        x_ref[...], f_ref[...], nt,
        preferred_element_type=jnp.float32) * inv_temp

    # Per-tile one-hot of memory labels, built in-kernel (label == -1 -> all-zero column,
    # reproducing the `labels != -1` filtering of index_add_).
    lab = lab_ref[0]                                   # (1, tn) int32
    tn = lab.shape[1]
    cpad = acc_ref.shape[1]
    onehot_t = (jax.lax.broadcasted_iota(jnp.int32, (cpad, tn), 0) == lab
                ).astype(jnp.float32)                  # (cpad, tn)

    # acc[b, c] += sum_j logits[b, j] * [labels[j] == c]      (MXU)
    acc_ref[...] += jax.lax.dot_general(
        logits, onehot_t, nt, preferred_element_type=jnp.float32)
    # cnt[0, c] += #{j : labels[j] == c}                       (MXU, tiny)
    cnt_ref[...] += jax.lax.dot_general(
        jnp.ones((1, tn), jnp.float32), onehot_t, nt,
        preferred_element_type=jnp.float32)

    @pl.when(n == pl.num_programs(1) - 1)
    def _finalize():
        counts = jnp.maximum(cnt_ref[...], 1.0)        # guard empty clusters (no NaN)
        sim = acc_ref[...] / counts                    # (tb, cpad), lane-dense (B, C) layout
        valid = jax.lax.broadcasted_iota(jnp.int32, sim.shape, 1) < num_clusters
        s = jnp.where(valid, sim, jnp.float32(-1e30))  # mask padded cluster columns
        mx = jnp.max(s, axis=1, keepdims=True)
        lse = jnp.log(jnp.sum(jnp.exp(s - mx), axis=1, keepdims=True)) + mx
        logp = jnp.where(valid, s - lse, 0.0)
        # per-sample cross-entropy against the one-hot target mask
        loss_ref[...] = -jnp.sum(mask_ref[...] * logp, axis=1, keepdims=True)


@functools.partial(jax.jit, static_argnames=("temp", "num_clusters", "tb", "tn"))
def _memory_loss(inputs, features, labels, indexes, *, temp, num_clusters, tb, tn):
    B, F = inputs.shape
    N = features.shape[0]
    assert B % tb == 0 and N % tn == 0
    grid_b = B // tb
    grid_n = N // tn
    cpad = max(128, ((num_clusters + 127) // 128) * 128)   # lane-dense, unmasked stores

    labels = labels.astype(jnp.int32)
    labels_tiled = labels.reshape(grid_n, 1, tn)            # one labels tile per N tile

    # Targets / soft mask glue (tiny). target == -1 -> all-zero row contributes 0 to the
    # mean (torch scatter_ would reject -1; callers are expected to pass valid indexes).
    targets = labels[indexes]
    soft_mask = jax.nn.one_hot(targets, cpad, dtype=jnp.float32)   # (B, cpad)

    kernel = functools.partial(_fused_memory_kernel,
                               inv_temp=1.0 / temp, num_clusters=num_clusters)

    # Rough VMEM budget (double-buffered inputs + accumulators), clamped to a safe range.
    est_bytes = 4 * (2 * tn * F + 2 * tb * F + 2 * tb * cpad
                     + 2 * 8 * tn + tb * cpad + cpad + 2 * tb)
    vmem_limit = int(min(32 * 1024 * 1024, max(16 * 1024 * 1024, 4 * est_bytes)))

    grid_spec = pltpu.PrefetchScalarGridSpec(
        num_scalar_prefetch=0,
        grid=(grid_b, grid_n),
        in_specs=[
            pl.BlockSpec((tb, F), lambda b, n: (b, 0)),        # inputs: resident across n
            pl.BlockSpec((tn, F), lambda b, n: (n, 0)),        # features: streamed tiles
            pl.BlockSpec((1, 1, tn), lambda b, n: (n, 0, 0)),  # labels tile (int32)
            pl.BlockSpec((tb, cpad), lambda b, n: (b, 0)),     # soft mask: resident across n
        ],
        out_specs=pl.BlockSpec((tb, 1), lambda b, n: (b, 0)),  # per-sample loss
        scratch_shapes=[
            pltpu.VMEM((tb, cpad), jnp.float32),               # sim accumulator
            pltpu.VMEM((1, cpad), jnp.float32),                # cluster counts
        ],
    )

    per_sample = pl.pallas_call(
        kernel,
        grid_spec=grid_spec,
        out_shape=jax.ShapeDtypeStruct((B, 1), jnp.float32),
        compiler_params=pltpu.CompilerParams(
            dimension_semantics=("parallel", "arbitrary"),     # B tiles parallel (v7x 2 TCs),
            vmem_limit_bytes=vmem_limit,                       # N is the reduction axis
        ),
    )(inputs, features, labels_tiled, soft_mask)

    return jnp.mean(per_sample)


class Memory:
    """JAX/Pallas port of reid.models.em.Memory (forward pass, symmetric=False)."""

    def __init__(self, num_features, num_samples, temp=0.05, momentum=0.2,
                 n_tile_target=512, b_tile_target=128):
        self.num_features = num_features
        self.num_samples = num_samples
        self.momentum = momentum
        self.temp = temp
        self.n_tile_target = n_tile_target
        self.b_tile_target = b_tile_target
        # Buffers (same defaults as the nn.Module; overwritten via set_memory()).
        # TODO(synk): storing features as bf16 halves the dominant HBM stream; kept f32
        # here for exact parity with the f32 reference.
        self.features = jnp.zeros((num_samples, num_features), jnp.float32)
        self.labels = jnp.zeros((num_samples,), jnp.int32)
        self.num_clusters = 1  # labels.max() + 1, hoisted out of forward()

    def set_memory(self, features, labels):
        """Set buffers; hoists the labels.max() host sync out of the training step."""
        self.features = features
        self.labels = labels.astype(jnp.int32)
        self.num_clusters = int(self.labels.max()) + 1

    def forward(self, inputs, indexes, symmetric=False):
        B = inputs.shape[0]
        tb = _pick_tile(B, self.b_tile_target)
        tn = _pick_tile(self.num_samples, self.n_tile_target)
        loss = _memory_loss(inputs, self.features, self.labels, indexes,
                            temp=self.temp, num_clusters=self.num_clusters,
                            tb=tb, tn=tn)
        # TODO(synk): symmetric=True branch (softmax(sim) * log_softmax(one-hot mask),
        # which contains log(0) terms) not implemented; default path only.
        return loss


def _reference_loss(inputs, indexes, features, labels, temp):
    """Pure-JAX reference mirroring the PyTorch forward."""
    logits = (inputs @ features.T) / temp
    C = int(labels.max()) + 1
    onehot = jax.nn.one_hot(labels, C, dtype=jnp.float32)        # (N, C), zero rows for -1
    sim = onehot.T @ logits.T                                    # (C, B)
    nums = onehot.sum(axis=0)[:, None]                           # (C, 1)
    sim = sim / nums
    targets = labels[indexes]
    mask = jax.nn.one_hot(targets, C, dtype=jnp.float32)
    logp = jax.nn.log_softmax(sim.T, axis=1)
    return -(mask * logp).sum(axis=1).mean()


if __name__ == "__main__":
    B, F, N, C = 8, 32, 128, 16

    key = jax.random.PRNGKey(0)
    k_in, k_feat = jax.random.split(key)

    # Batch of L2-normalized embeddings (typical ReID features).
    inputs = jax.random.normal(k_in, (B, F), dtype=jnp.float32)
    inputs = inputs / jnp.linalg.norm(inputs, axis=1, keepdims=True)

    # Small n_tile_target so the test exercises multiple reduction steps / the accumulator.
    mem = Memory(num_features=F, num_samples=N, temp=0.05, momentum=0.2, n_tile_target=32)

    # Deterministic, non-trivial buffer contents (zero features would be degenerate).
    feats = jax.random.normal(k_feat, (N, F), dtype=jnp.float32)
    feats = feats / jnp.linalg.norm(feats, axis=1, keepdims=True)
    base_labels = jnp.arange(N, dtype=jnp.int32) % C
    labels = jnp.where(jnp.arange(N) % 7 == 3, -1, base_labels).astype(jnp.int32)
    mem.set_memory(feats, labels)

    # Indexes into the memory bank (chosen so their labels are != -1).
    indexes = jnp.array([0, 1, 2, 4, 5, 6, 8, 9], dtype=jnp.int32)

    loss = mem.forward(inputs, indexes)
    loss = jax.block_until_ready(loss)

    ref = _reference_loss(inputs, indexes, mem.features, mem.labels, mem.temp)
    assert jnp.isfinite(loss), loss
    assert jnp.allclose(loss, ref, rtol=1e-4, atol=1e-4), (loss, ref)

    print("KERNEL_OK")
</pallas_src>

<mosaic_0001>
module attributes {stable_mosaic.version = 11 : i64} {
  func.func @_fused_memory_kernel(%arg0: i32, %arg1: i32, %arg2: memref<8x32xf32, #tpu.memory_space<vmem>>, %arg3: memref<32x32xf32, #tpu.memory_space<vmem>>, %arg4: memref<1x1x32xi32, #tpu.memory_space<vmem>>, %arg5: memref<8x128xf32, #tpu.memory_space<vmem>>, %arg6: memref<8x1xf32, #tpu.memory_space<vmem>>, %arg7: memref<8x128xf32, #tpu.memory_space<vmem>>, %arg8: memref<1x128xf32, #tpu.memory_space<vmem>>) attributes {dimension_semantics = [#tpu.dimension_semantics<parallel>, #tpu.dimension_semantics<arbitrary>], iteration_bounds = array<i64: 1, 4>, scalar_prefetch = 0 : i64, scratch_operands = 2 : i64, tpu.core_type = #tpu.core_type<tc>, window_params = [{transform_indices = @transform_0, window_bounds = array<i64: 8, 32>}, {transform_indices = @transform_1, window_bounds = array<i64: 32, 32>}, {transform_indices = @transform_2, window_bounds = array<i64: 1, 1, 32>}, {transform_indices = @transform_3, window_bounds = array<i64: 8, 128>}, {transform_indices = @transform_4, window_bounds = array<i64: 8, 1>}]} {
    %c0_i32 = arith.constant 0 : i32
    %0 = arith.cmpi eq, %arg1, %c0_i32 : i32
    %1 = arith.extui %0 : i1 to i32
    %c0_i32_0 = arith.constant 0 : i32
    %2 = arith.cmpi ne, %1, %c0_i32_0 : i32
    scf.if %2 {
      %cst_20 = arith.constant 0.000000e+00 : f32
      %27 = vector.broadcast %cst_20 : f32 to vector<8x128xf32>
      %c0_21 = arith.constant 0 : index
      %c0_22 = arith.constant 0 : index
      %28 = vector.load %arg7[%c0_21, %c0_22] : memref<8x128xf32, #tpu.memory_space<vmem>>, vector<8x128xf32>
      tpu.vector_store %arg7[%c0_21, %c0_22], %27 {strides = array<i32>} : memref<8x128xf32, #tpu.memory_space<vmem>>, vector<8x128xf32>,
      %cst_23 = arith.constant 0.000000e+00 : f32
      %29 = vector.broadcast %cst_23 : f32 to vector<1x128xf32>
      %c0_24 = arith.constant 0 : index
      %c0_25 = arith.constant 0 : index
      %30 = vector.load %arg8[%c0_24, %c0_25] : memref<1x128xf32, #tpu.memory_space<vmem>>, vector<1x128xf32>
      tpu.vector_store %arg8[%c0_24, %c0_25], %29 {strides = array<i32>} : memref<1x128xf32, #tpu.memory_space<vmem>>, vector<1x128xf32>,
    } else {
    }
    %c0 = arith.constant 0 : index
    %c0_1 = arith.constant 0 : index
    %3 = vector.load %arg2[%c0, %c0_1] : memref<8x32xf32, #tpu.memory_space<vmem>>, vector<8x32xf32>
    %c0_2 = arith.constant 0 : index
    %c0_3 = arith.constant 0 : index
    %4 = vector.load %arg3[%c0_2, %c0_3] : memref<32x32xf32, #tpu.memory_space<vmem>>, vector<32x32xf32>
    %cst = arith.constant dense<0.000000e+00> : vector<8x32xf32>
    %5 = tpu.matmul %3, %4, %cst {dimension_numbers = #tpu.dot_dimension_numbers<[1], [1], [0], [0], [0, 0, 1, 0], [], []>} : vector<8x32xf32>, vector<32x32xf32>, vector<8x32xf32> -> vector<8x32xf32>
    %cst_4 = arith.constant 2.000000e+01 : f32
    %6 = vector.broadcast %cst_4 : f32 to vector<8x32xf32>
    %7 = arith.mulf %5, %6 : vector<8x32xf32>
    %c0_5 = arith.constant 0 : index
    %c0_6 = arith.constant 0 : index
    %c0_7 = arith.constant 0 : index
    %8 = vector.load %arg4[%c0_5, %c0_6, %c0_7] : memref<1x1x32xi32, #tpu.memory_space<vmem>>, vector<1x1x32xi32>
    %9 = vector.shape_cast %8 : vector<1x1x32xi32> to vector<1x32xi32>
    %10 = tpu.iota {dimensions = array<i32: 0>} : vector<128x32xi32>
    %11 = vector.broadcast %9 : vector<1x32xi32> to vector<128x32xi32>
    %12 = arith.cmpi eq, %10, %11 : vector<128x32xi32>
    %13 = arith.extui %12 : vector<128x32xi1> to vector<128x32xi32>
    %14 = arith.sitofp %13 : vector<128x32xi32> to vector<128x32xf32>
    %c0_8 = arith.constant 0 : index
    %c0_9 = arith.constant 0 : index
    %15 = vector.load %arg7[%c0_8, %c0_9] : memref<8x128xf32, #tpu.memory_space<vmem>>, vector<8x128xf32>
    %cst_10 = arith.constant dense<0.000000e+00> : vector<8x128xf32>
    %16 = tpu.matmul %7, %14, %cst_10 {dimension_numbers = #tpu.dot_dimension_numbers<[1], [1], [0], [0], [0, 0, 1, 0], [], []>} : vector<8x32xf32>, vector<128x32xf32>, vector<8x128xf32> -> vector<8x128xf32>
    %17 = arith.addf %15, %16 : vector<8x128xf32>
    %c0_11 = arith.constant 0 : index
    %c0_12 = arith.constant 0 : index
    %18 = vector.load %arg7[%c0_11, %c0_12] : memref<8x128xf32, #tpu.memory_space<vmem>>, vector<8x128xf32>
    tpu.vector_store %arg7[%c0_11, %c0_12], %17 {strides = array<i32>} : memref<8x128xf32, #tpu.memory_space<vmem>>, vector<8x128xf32>,
    %c0_13 = arith.constant 0 : index
    %c0_14 = arith.constant 0 : index
    %19 = vector.load %arg8[%c0_13, %c0_14] : memref<1x128xf32, #tpu.memory_space<vmem>>, vector<1x128xf32>
    %cst_15 = arith.constant 1.000000e+00 : f32
    %20 = vector.broadcast %cst_15 : f32 to vector<1x32xf32>
    %cst_16 = arith.constant dense<0.000000e+00> : vector<1x128xf32>
    %21 = tpu.matmul %20, %14, %cst_16 {dimension_numbers = #tpu.dot_dimension_numbers<[1], [1], [0], [0], [0, 0, 1, 0], [], []>} : vector<1x32xf32>, vector<128x32xf32>, vector<1x128xf32> -> vector<1x128xf32>
    %22 = arith.addf %19, %21 : vector<1x128xf32>
    %c0_17 = arith.constant 0 : index
    %c0_18 = arith.constant 0 : index
    %23 = vector.load %arg8[%c0_17, %c0_18] : memref<1x128xf32, #tpu.memory_space<vmem>>, vector<1x128xf32>
    tpu.vector_store %arg8[%c0_17, %c0_18], %22 {strides = array<i32>} : memref<1x128xf32, #tpu.memory_space<vmem>>, vector<1x128xf32>,
    %c3_i32 = arith.constant 3 : i32
    %24 = arith.cmpi eq, %arg1, %c3_i32 : i32
    %25 = arith.extui %24 : i1 to i32
    %c0_i32_19 = arith.constant 0 : i32
    %26 = arith.cmpi ne, %25, %c0_i32_19 : i32
    scf.if %26 {
      %c0_20 = arith.constant 0 : index
      %c0_21 = arith.constant 0 : index
      %27 = vector.load %arg8[%c0_20, %c0_21] : memref<1x128xf32, #tpu.memory_space<vmem>>, vector<1x128xf32>
      %cst_22 = arith.constant 1.000000e+00 : f32
      %28 = vector.broadcast %cst_22 : f32 to vector<1x128xf32>
      %29 = arith.maximumf %27, %28 : vector<1x128xf32>
      %c0_23 = arith.constant 0 : index
      %c0_24 = arith.constant 0 : index
      %30 = vector.load %arg7[%c0_23, %c0_24] : memref<8x128xf32, #tpu.memory_space<vmem>>, vector<8x128xf32>
      %31 = vector.broadcast %29 : vector<1x128xf32> to vector<8x128xf32>
      %32 = arith.divf %30, %31 : vector<8x128xf32>
      %33 = tpu.iota {dimensions = array<i32: 1>} : vector<8x128xi32>
      %c16_i32 = arith.constant 16 : i32
      %34 = vector.broadcast %c16_i32 : i32 to vector<8x128xi32>
      %35 = arith.cmpi slt, %33, %34 : vector<8x128xi32>
      %cst_25 = arith.constant -1.000000e+30 : f32
      %36 = vector.broadcast %cst_25 : f32 to vector<8x128xf32>
      %37 = arith.select %35, %32, %36 : vector<8x128xi1>, vector<8x128xf32>
      %cst_26 = arith.constant dense<0xFF800000> : vector<8xf32>
      %38 = vector.multi_reduction <maximumf>, %37, %cst_26 [1] : vector<8x128xf32> to vector<8xf32>
      %39 = vector.shape_cast %38 : vector<8xf32> to vector<8x1xf32>
      %40 = vector.broadcast %39 : vector<8x1xf32> to vector<8x128xf32>
      %41 = arith.subf %37, %40 : vector<8x128xf32>
      %42 = math.exp %41 : vector<8x128xf32>
      %cst_27 = arith.constant dense<0.000000e+00> : vector<8xf32>
      %43 = vector.multi_reduction <add>, %42, %cst_27 [1] : vector<8x128xf32> to vector<8xf32>
      %44 = vector.shape_cast %43 : vector<8xf32> to vector<8x1xf32>
      %45 = math.log %44 : vector<8x1xf32>
      %46 = arith.addf %45, %39 : vector<8x1xf32>
      %47 = vector.broadcast %46 : vector<8x1xf32> to vector<8x128xf32>
      %48 = arith.subf %37, %47 : vector<8x128xf32>
      %cst_28 = arith.constant 0.000000e+00 : f32
      %49 = vector.broadcast %cst_28 : f32 to vector<8x128xf32>
      %50 = arith.select %35, %48, %49 : vector<8x128xi1>, vector<8x128xf32>
      %c0_29 = arith.constant 0 : index
      %c0_30 = arith.constant 0 : index
      %51 = vector.load %arg5[%c0_29, %c0_30] : memref<8x128xf32, #tpu.memory_space<vmem>>, vector<8x128xf32>
      %52 = arith.mulf %51, %50 : vector<8x128xf32>
      %cst_31 = arith.constant dense<0.000000e+00> : vector<8xf32>
      %53 = vector.multi_reduction <add>, %52, %cst_31 [1] : vector<8x128xf32> to vector<8xf32>
      %54 = vector.shape_cast %53 : vector<8xf32> to vector<8x1xf32>
      %cst_32 = arith.constant 0.000000e+00 : f32
      %55 = vector.broadcast %cst_32 : f32 to vector<8x1xf32>
      %56 = arith.subf %55, %54 : vector<8x1xf32>
      %c0_33 = arith.constant 0 : index
      %c0_34 = arith.constant 0 : index
      %57 = vector.load %arg6[%c0_33, %c0_34] : memref<8x1xf32, #tpu.memory_space<vmem>>, vector<8x1xf32>
      tpu.vector_store %arg6[%c0_33, %c0_34], %56 {strides = array<i32>} : memref<8x1xf32, #tpu.memory_space<vmem>>, vector<8x1xf32>,
    } else {
    }
    return
  }
  func.func @transform_0(%arg0: i32, %arg1: i32) -> (i32, i32) {
    %c0_i32 = arith.constant 0 : i32
    %c0_i32_0 = arith.constant 0 : i32
    return %arg0, %c0_i32 : i32, i32
  }
  func.func @transform_1(%arg0: i32, %arg1: i32) -> (i32, i32) {
    %c0_i32 = arith.constant 0 : i32
    %c0_i32_0 = arith.constant 0 : i32
    return %arg1, %c0_i32 : i32, i32
  }
  func.func @transform_2(%arg0: i32, %arg1: i32) -> (i32, i32, i32) {
    %c0_i32 = arith.constant 0 : i32
    %c0_i32_0 = arith.constant 0 : i32
    %c0_i32_1 = arith.constant 0 : i32
    return %arg1, %c0_i32, %c0_i32_0 : i32, i32, i32
  }
  func.func @transform_3(%arg0: i32, %arg1: i32) -> (i32, i32) {
    %c0_i32 = arith.constant 0 : i32
    %c0_i32_0 = arith.constant 0 : i32
    return %arg0, %c0_i32 : i32, i32
  }
  func.func @transform_4(%arg0: i32, %arg1: i32) -> (i32, i32) {
    %c0_i32 = arith.constant 0 : i32
    %c0_i32_0 = arith.constant 0 : i32
    return %arg0, %c0_i32 : i32, i32
  }
}

</mosaic_0001>

<bundles_post_ra>
// kernel: _memory_loss.1
= control target key start
LH: loop header
LB: loop body
LE: loop exit
PB: predicated region body
PF: predicated region fallthrough
CT: control target
= control target key end

     0   :  { %s1112_s15 = smov 0   ;;  %s1114_s16 = smov 0   ;;  %s1287_s0 = inlined_call_operand.vmem [shape: f32[8,32], index: 0, kind: input, shape index: {}]   ;;  %s1288_s1 = inlined_call_operand.vmem [shape: f32[128,32], index: 1, kind: input, shape index: {}]   ;;  %s1289_s2 = inlined_call_operand.vmem [shape: s32[4,1,32], index: 2, kind: input, shape index: {}]   ;;  %s1290_s3 = inlined_call_operand.vmem [shape: f32[8,128], index: 3, kind: input, shape index: {}]   ;;  %s1291_s4 = inlined_call_operand.vmem [shape: f32[8,1], index: 4, kind: output, shape index: {}]  }
   0x1   :  { %s1116_s17 = smov 0  }
   0x2 LB: > { %s23_s18 = sadd.s32 1, %s1076_s16  ;;  %p767_p0 = scmp.ge.s32.totalorder %s1080_s17, 1  ;;  %s1080_s17 = sphi %s1116_s17, %s14_s17   ;;  %s1076_s16 = sphi %s1114_s16, %s1295_s16   ;;  %s1072_s15 = sphi %s1112_s15, %s1294_s15  }
   0x3   : > { %p24_p1 = scmp.ge.s32.totalorder %s23_s18, 4  ;;  %p201_p2 = scmp.lt.s32.totalorder %s1080_s17, 5 }
   0x5   : > { %s1297_s18 = smov (%p24_p1, %s23_s18), 0  ;;  %p202_p3 = pnand %p767_p0, %p201_p2 }
   0x6   : > { %s768_s19 = sshll.u32 (!%p202_p3), %s1072_s15, 2  ;;  %p247_p4 = scmp.lt.s32.totalorder (!%p202_p3), %s1072_s15, 3 }
   0x7   : > { %205 = sbr.rel (%p202_p3) target bundleno = 943 (0x3af), region = 36  ;;  %p242_p5 = scmp.lt.s32.totalorder (!%p202_p3), %s768_s19, 15 }
   0x8   : > { %p770_p6 = scmp.ne.s32.totalorder (!%p202_p3), %s1072_s15, 0 }
   0xe   : > { %s248_s20 = scalar_select %p247_p4, %s1072_s15, 3 }
   0xf   : > { %s1299_s19 = smov (!%p242_p5, %s768_s19), 15  ;;  %261 = sbr.rel (%p770_p6) target bundleno = 22 (0x16), region = 40 }
  0x10   : > { %s249_s23 = scalar_lea.vmem %s1289_s2, %s248_s20  ;;  %s769_s24 = sshll.u32 %s1299_s19, 3  ;;  %v1082_v0 = vmov (!%p770_p6), 0.0  }
  0x11   : > { %s245_s27 = scalar_lea.vmem %s1288_s1, %s769_s24  ;;  %262 = vst [vmem:[#allocation2] sm:$0xff] (!%p770_p6), %v1082_v0  ;;  %263 = vst [vmem:[#allocation3] sm:$0x1] (!%p770_p6), %v1082_v0 }
  0x16 PF: > { %v265_v1 = vld [vmem:[%s245_s27] sm:$0xff]  ;;  %v266_v2 = vld [vmem:[%s245_s27 + $0x8] sm:$0xff]  ;;  %vm269_vm0 = vcmask 261120   ;;  %v357_v3 = vlaneseq  ;;  %v1083_v4 = vmov 0.0|0.0   ;;  %vm1084_vm2 = vmmov 0   ;;  %v267_v10 = vld [vmem:[%s245_s27 + $0x10] sm:$0xff] }
  0x17   : > { %951 = vmatprep.subr.bf16.mxu0 %v1083_v4  ;;  %v952_v5 = vpack.c.bf16 %v266_v2, %v265_v1  ;;  %vm1145_vm1 = vmpackc.low %vm269_vm0, %vm269_vm0  ;;  %959 = vmatprep.subr.bf16.mxu1 %v1083_v4  ;;  %v1085_v7 = vmov 0.0   ;;  %v1152_v8 = vld [vmem:[%s249_s23] ss:$0 sm:$0xff]  ;;  %v268_v11 = vld [vmem:[%s245_s27 + $0x18] sm:$0xff]  ;;  %v1086_v53 = vmov 1.0   ;;  %p827_p7 = scmp.ne.s32.totalorder %s1072_s15, 3 }
  0x18   : > { %878 = vmatprep.mubr.msk.f32.mxu0 %vm1084_vm2, %v1085_v7  ;;  %v1155_v9 = vshrl.u32 %v357_v3, 7  ;;  %913 = vmatprep.mubr.msk.f32.mxu1 %vm1084_vm2, %v1085_v7  ;;  %v956_v16 = vpack.c.bf16 %v268_v11, %v267_v10  ;;  %v264_v24 = vld [vmem:[%s1287_s0] sm:$0xff]  ;;  %v550_v57 = vld [vmem:[#allocation3] sm:$0x1]  ;;  %v642_v6 = vand.u32 (!%p827_p7), 127, %v357_v3 }
  0x19   : > { %954 = vmatpush3.bf16.xpose.msk.msra.mxu0 %vm1145_vm1, %v952_v5  ;;  %v426_v61 = vld [vmem:[#allocation2] sm:$0xff] }
  0x1a   : > { %955 = vmatprep.subr.bf16.mxu0 %v1083_v4  ;;  %v359_v12 = vadd.s32 8, %v1155_v9  ;;  %vm378_vm3 = vcmp.eq.s32.totalorder %v1155_v9, %v1152_v8  ;;  %v360_v13 = vadd.s32 16, %v1155_v9  ;;  %v361_v14 = vadd.s32 24, %v1155_v9  ;;  %v657_v3 = vld [vmem:[%s1290_s3] sm:$0xff] (!%p827_p7) }
  0x1b   : > { %v777_v15 = vsel %vm378_vm3, 1.0, %v1085_v7  ;;  %v362_v21 = vadd.s32 32, %v1155_v9  ;;  %v363_v22 = vadd.s32 40, %v1155_v9  ;;  %v364_v27 = vadd.s32 48, %v1155_v9 }
  0x1c   : > { %vm379_vm4 = vcmp.eq.s32.totalorder %v359_v12, %v1152_v8  ;;  %vm380_vm5 = vcmp.eq.s32.totalorder %v360_v13, %v1152_v8  ;;  %vm381_vm6 = vcmp.eq.s32.totalorder %v361_v14, %v1152_v8  ;;  %v365_v28 = vadd.s32 56, %v1155_v9 }
  0x1d   : > { %v778_v17 = vsel %vm379_vm4, 1.0, %v1085_v7  ;;  %v779_v19 = vsel %vm380_vm5, 1.0, %v1085_v7  ;;  %v780_v20 = vsel %vm381_vm6, 1.0, %v1085_v7  ;;  %vm382_vm7 = vcmp.eq.s32.totalorder %v362_v21, %v1152_v8 }
  0x1e   : > { %v960_v18 = vpack.c.bf16 %v778_v17, %v777_v15  ;;  %v964_v23 = vpack.c.bf16 %v780_v20, %v779_v19  ;;  %vm383_vm8 = vcmp.eq.s32.totalorder %v363_v22, %v1152_v8  ;;  %v781_v25 = vsel %vm382_vm7, 1.0, %v1085_v7 }
  0x1f   : > { %v782_v26 = vsel %vm383_vm8, 1.0, %v1085_v7  ;;  %vm384_vm9 = vcmp.eq.s32.totalorder %v364_v27, %v1152_v8  ;;  %vm385_vm10 = vcmp.eq.s32.totalorder %v365_v28, %v1152_v8  ;;  %v366_v32 = vadd.s32 64, %v1155_v9 }
  0x20   : > { %962 = vmatpush3.bf16.xpose.msk.msra.mxu1 %vm1145_vm1, %v960_v18  ;;  %v968_v29 = vpack.c.bf16 %v782_v26, %v781_v25  ;;  %v783_v30 = vsel %vm384_vm9, 1.0, %v1085_v7  ;;  %v784_v31 = vsel %vm385_vm10, 1.0, %v1085_v7  ;;  %v367_v33 = vadd.s32 72, %v1155_v9 }
  0x21   : > { %958 = vmatpush3.bf16.xpose.msk.msra.mxu0 %vm1145_vm1, %v956_v16  ;;  %963 = vmatprep.subr.bf16.mxu1 %v1083_v4  ;;  %v972_v34 = vpack.c.bf16 %v784_v31, %v783_v30  ;;  %vm386_vm11 = vcmp.eq.s32.totalorder %v366_v32, %v1152_v8  ;;  %v368_v37 = vadd.s32 80, %v1155_v9  ;;  %v369_v38 = vadd.s32 88, %v1155_v9 }
  0x22   : > { %991 = vmatprep.subr.bf16.mxu0 %v1083_v4  ;;  %vm387_vm12 = vcmp.eq.s32.totalorder %v367_v33, %v1152_v8  ;;  %v785_v35 = vsel %vm386_vm11, 1.0, %v1085_v7  ;;  %v370_v42 = vadd.s32 96, %v1155_v9  ;;  %v371_v43 = vadd.s32 104, %v1155_v9 }
  0x23   : > { %v786_v36 = vsel %vm387_vm12, 1.0, %v1085_v7  ;;  %vm388_vm13 = vcmp.eq.s32.totalorder %v368_v37, %v1152_v8  ;;  %vm389_vm14 = vcmp.eq.s32.totalorder %v369_v38, %v1152_v8  ;;  %v372_v47 = vadd.s32 112, %v1155_v9 }
  0x24   : > { %v976_v39 = vpack.c.bf16 %v786_v36, %v785_v35  ;;  %v787_v40 = vsel %vm388_vm13, 1.0, %v1085_v7  ;;  %v788_v41 = vsel %vm389_vm14, 1.0, %v1085_v7  ;;  %vm390_vm15 = vcmp.eq.s32.totalorder %v370_v42, %v1152_v8 }
  0x25   : > { %v980_v44 = vpack.c.bf16 %v788_v41, %v787_v40  ;;  %v789_v45 = vsel %vm390_vm15, 1.0, %v1085_v7  ;;  %v373_v48 = vadd.s32 120, %v1155_v9  ;;  %vm392_vm3 = vcmp.eq.s32.totalorder %v372_v47, %v1152_v8 }
  0x26   : > { %v791_v50 = vsel %vm392_vm3, 1.0, %v1085_v7  ;;  %v636_v2 = vsub.s32 (!%p827_p7), 0, %v1155_v9 }
  0x27   : > { %vm393_vm4 = vcmp.eq.s32.totalorder %v373_v48, %v1152_v8 }
  0x28   : > { %879 = vmatmul.mubr.msk.f32.vlgmr.msra.gmra.mrb[0].mxu0 %vm269_vm0, %v264_v24  ;;  %966 = vmatpush3.bf16.xpose.msk.msra.mxu1 %vm1145_vm1, %v964_v23  ;;  %v792_v51 = vsel %vm393_vm4, 1.0, %v1085_v7 }
  0x29   : > { %994 = vmatpush3.bf16.xpose.msk.msra.mxu0 %vm1145_vm1, %v960_v18  ;;  %967 = vmatprep.subr.bf16.mxu1 %v1083_v4  ;;  %v988_v52 = vpack.c.bf16 %v792_v51, %v791_v50 }
  0x2a   : > { %995 = vmatprep.subr.bf16.mxu0 %v1083_v4  ;;  %948 = vmatprep.mubr.msk.f32.mxu0 %vm1084_vm2, %v1085_v7  ;;  %vm391_vm2 = vcmp.eq.s32.totalorder %v371_v43, %v1152_v8 }
  0x2b   : > { %v790_v46 = vsel %vm391_vm2, 1.0, %v1085_v7 }
  0x2c   : > { %v984_v49 = vpack.c.bf16 %v790_v46, %v789_v45 }
  0x30   : > { %970 = vmatpush3.bf16.xpose.msk.msra.mxu1 %vm1145_vm1, %v968_v29 }
  0x31   : > { %998 = vmatpush3.bf16.xpose.msk.msra.mxu0 %vm1145_vm1, %v964_v23  ;;  %971 = vmatprep.subr.bf16.mxu1 %v1083_v4 }
  0x32   : > { %999 = vmatprep.subr.bf16.mxu0 %v1083_v4 }
  0x38   : > { %974 = vmatpush3.bf16.xpose.msk.msra.mxu1 %vm1145_vm1, %v972_v34 }
  0x39   : > { %1002 = vmatpush3.bf16.xpose.msk.msra.mxu0 %vm1145_vm1, %v968_v29  ;;  %975 = vmatprep.subr.bf16.mxu1 %v1083_v4 }
  0x3a   : > { %1003 = vmatprep.subr.bf16.mxu0 %v1083_v4 }
  0x40   : > { %978 = vmatpush3.bf16.xpose.msk.msra.mxu1 %vm1145_vm1, %v976_v39 }
  0x41   : > { %1006 = vmatpush3.bf16.xpose.msk.msra.mxu0 %vm1145_vm1, %v972_v34  ;;  %979 = vmatprep.subr.bf16.mxu1 %v1083_v4 }
  0x42   : > { %1007 = vmatprep.subr.bf16.mxu0 %v1083_v4 }
  0x48   : > { %982 = vmatpush3.bf16.xpose.msk.msra.mxu1 %vm1145_vm1, %v980_v44 }
  0x49   : > { %1010 = vmatpush3.bf16.xpose.msk.msra.mxu0 %vm1145_vm1, %v976_v39  ;;  %983 = vmatprep.subr.bf16.mxu1 %v1083_v4 }
  0x4a   : > { %1011 = vmatprep.subr.bf16.mxu0 %v1083_v4 }
  0x50   : > { %986 = vmatpush3.bf16.xpose.msk.msra.mxu1 %vm1145_vm1, %v984_v49 }
  0x51   : > { %1014 = vmatpush3.bf16.xpose.msk.msra.mxu0 %vm1145_vm1, %v980_v44  ;;  %987 = vmatprep.subr.bf16.mxu1 %v1083_v4 }
  0x52   : > { %1015 = vmatprep.subr.bf16.mxu0 %v1083_v4 }
  0x58   : > { %990 = vmatpush3.bf16.xpose.msk.msra.mxu1 %vm1145_vm1, %v988_v52 }
  0x59   : > { %1018 = vmatpush3.bf16.xpose.msk.msra.mxu0 %vm1145_vm1, %v984_v49 }
  0x5a   : > { %1019 = vmatprep.subr.bf16.mxu0 %v1083_v4 }
  0x61   : > { %1022 = vmatpush3.bf16.xpose.msk.msra.mxu0 %vm1145_vm1, %v988_v52  ;;  %vm662_vm1 = vcmask (!%p827_p7), 7168  }
  0x68   : > { %949 = vmatmul.mubr.msk.f32.vlgmr.msra.gmra.mrb[2].mxu0 %vm269_vm0, %v1086_v53 }
  0xfb   : > { %v351_v54 = vpop.f32.mrb[0].mxu0 }
  0xfc   : > { %v355_v55 = vmul.f32 20.0, %v351_v54  ;;  %v880_v56 = vpop.f32.mrb[1].mxu0 }
  0xfe   : > { %914 = vmatmul.mubr.msk.f32.vlgmr.msra.gmra.mrb[0].mxu1 %vm269_vm0, %v355_v55  ;;  %vm643_vm0 = vcmp.lt.s32.totalorder (!%p827_p7), %v642_v6, 16 }
 0x13b   : > { %v620_v58 = vpop.f32.mrb[2].mxu0 }
 0x13c   : > { %v624_v59 = vadd.f32 %v620_v58, %v550_v57  ;;  %v950_v60 = vpop.f32.mrb[3].mxu0 }
 0x13e   : > { %625 = vst [vmem:[#allocation3] sm:$0x1] %v624_v59 }
 0x145   : > { %v630_v1 = vld [vmem:[#allocation3] sm:$0x1] (!%p827_p7) }
 0x146   : > { %v631_v4 = vmax.f32 (!%p827_p7), %v630_v1, 1.0 }
 0x148   : > { %v637_v5 = vrot.slane (!%p827_p7), %v631_v4, %v636_v2 }
 0x14a   : > { %1052 = vrcp.f32 (!%p827_p7), %v637_v5 }
 0x154   : > { %v1053_v8 = vpop.eup (!%p827_p7), %1052 }
 0x1ce   : > { %629 = sbr.rel (%p827_p7) target bundleno = 943 (0x3af), region = 44 }
 0x1d1   : > { %v544_v62 = vpop.f32.mrb[0].mxu1 }
 0x1d2   : > { %v548_v63 = vadd.f32 %v544_v62, %v426_v61  ;;  %v915_v0 = vpop.f32.mrb[1].mxu1 }
 0x1d4   : > { %549 = vst [vmem:[#allocation2] sm:$0xff] %v548_v63 }
 0x1db   : > { %v632_v7 = vld [vmem:[#allocation2] sm:$0xff] }
 0x1dc   : > { %v640_v10 = vmul.f32 %v1053_v8, %v632_v7 }
 0x1de   : > { %v644_v11 = vsel %vm643_vm0, %v640_v10, -1e+30 }
 0x1df   : > { %645 = vmax.xlane.f32.xlu0 %v644_v11 }
 0x26c   : > { %v646_v12 = vpop.xlane.xlu0 %645 }
 0x26d   : > { %v647_v13 = vsub.f32 %v644_v11, %v646_v12 }
 0x26f   : > { %v648_v14 = vmul.f32 1.442695, %v647_v13 }
 0x271   : > { %1054 = vpow2.f32 %v648_v14 }
 0x27b   : > { %v1055_v15 = vpop.eup %1054 }
 0x27c   : > { %650 = vadd.xlane.f32.xlu0 %v1055_v15 }
 0x309   : > { %v651_v16 = vpop.xlane.xlu0 %650 }
 0x30a   : > { %1056 = vlog2.f32 %v651_v16 }
 0x314   : > { %v1057_v9 = vpop.eup %1056 }
 0x315   : > { %v653_v17 = vmul.f32 0.6931472, %v1057_v9 }
 0x317   : > { %v654_v18 = vadd.f32 %v653_v17, %v646_v12 }
 0x319   : > { %v655_v19 = vsub.f32 %v644_v11, %v654_v18 }
 0x31b   : > { %v656_v20 = vsel %vm643_vm0, %v655_v19, 0.0 }
 0x31c   : > { %v658_v21 = vmul.f32 %v657_v3, %v656_v20 }
 0x31e   : > { %659 = vadd.xlane.f32.xlu1 %v658_v21 }
 0x3ab   : > { %v660_v22 = vpop.xlane.xlu1 %659 }
 0x3ac   : > { %v661_v23 = vsub.f32 0.0, %v660_v22 }
 0x3ae   : > { %663 = vst.msk [vmem:[%s1291_s4] sm:$0xff] %vm662_vm1, %v661_v23 }
 0x3af PF: > { %s14_s17 = sadd.s32 1, %s1080_s17   ;;  %s1294_s15 = smov %s1076_s16 }
 0x3b0   : > { %p11_p8 = scmp.ge.s32.totalorder %s14_s17, 6   ;;  %s1295_s16 = smov %s1297_s18 }
 0x3b2   :  { %13 = sbr.rel (!%p11_p8) target bundleno = 2 (0x2), region = 83 }

</bundles_post_ra>
